<compile_context>
chip_gen: v6e
topology: v6e:2x2x1
jax: 0.10.0
libtpu: 0.0.40
codegen_flags: <defaults>
</compile_context>

<pallas_src>
import jax
import jax.numpy as jnp
from jax.experimental import pallas as pl
from jax.experimental.pallas import tpu as pltpu


def _classifier_kernel(x_ref, w_ref, b_ref, o_ref):
    # x_ref: (tm, D)  w_ref: (D, N)  b_ref: (1, N)  o_ref: (tm, N)
    acc = jnp.dot(x_ref[...], w_ref[...], preferred_element_type=jnp.float32)
    o_ref[...] = (acc + b_ref[...].astype(jnp.float32)).astype(o_ref.dtype)


def _round_up(x, m):
    return ((x + m - 1) // m) * m


def classifier_forward(x, weight, bias, *, tm=None):
    """x: [B, T, D]; weight: [D, 3]; bias: [3] -> [B, T, 3]."""
    B, T, D = x.shape
    N = weight.shape[1]
    M = B * T

    itemsize = jnp.dtype(x.dtype).itemsize
    # Packed sublane count: 8 for 4-byte, 16 for 2-byte, 32 for 1-byte dtypes.
    sublane = max(8, 32 // itemsize)

    if tm is None:
        # 16 MiB per activation buffer (32 MiB double-buffered) — fits the
        # explicit 48 MiB scoped limit below on every generation (v7x 64 MiB
        # physical, v5e/v6e 128 MiB physical).  Returns diminish past ~8192
        # rows; never blow a small M up to a huge tile.
        per_buf_budget = 16 * 1024 * 1024
        tm_cap = max(sublane, (per_buf_budget // (D * itemsize)) // sublane * sublane)
        tm = min(8192, tm_cap, _round_up(M, sublane))

    grid_m = pl.cdiv(M, tm)

    x2d = x.reshape(M, D)
    b2d = bias.reshape(1, N)

    cost = pl.CostEstimate(
        flops=2 * M * D * N,
        transcendentals=0,
        bytes_accessed=(M * D * itemsize
                        + D * N * jnp.dtype(weight.dtype).itemsize
                        + N * jnp.dtype(bias.dtype).itemsize
                        + M * N * itemsize),
    )

    out2d = pl.pallas_call(
        _classifier_kernel,
        out_shape=jax.ShapeDtypeStruct((M, N), x.dtype),
        grid_spec=pltpu.PrefetchScalarGridSpec(
            num_scalar_prefetch=0,
            grid=(grid_m,),
            in_specs=[
                pl.BlockSpec((tm, D), lambda i: (i, 0)),   # activations tile (streamed)
                pl.BlockSpec((D, N), lambda i: (0, 0)),    # full weight (VMEM-resident)
                pl.BlockSpec((1, N), lambda i: (0, 0)),    # bias (VMEM-resident)
            ],
            out_specs=pl.BlockSpec((tm, N), lambda i: (i, 0)),
        ),
        compiler_params=pltpu.CompilerParams(
            dimension_semantics=("parallel",),        # lets v7x shard rows over 2 TCs
            vmem_limit_bytes=48 * 1024 * 1024,        # explicit, generation-safe budget
        ),
        cost_estimate=cost,
    )(x2d, weight, b2d)

    return out2d.reshape(B, T, N)


if __name__ == "__main__":
    # Small shapes consistent with the module: B=2, T=8, hidden=32.
    B, T, D = 2, 8, 32
    key = jax.random.PRNGKey(0)
    kx, kw, kb = jax.random.split(key, 3)

    x = jax.random.normal(kx, (B, T, D), dtype=jnp.float32)
    # Deterministic parameter init (nn.Linear-style uniform bound).
    bound = 1.0 / (D ** 0.5)
    weight = jax.random.uniform(kw, (D, 3), dtype=jnp.float32, minval=-bound, maxval=bound)
    bias = jax.random.uniform(kb, (3,), dtype=jnp.float32, minval=-bound, maxval=bound)

    score = classifier_forward(x, weight, bias)
    jax.block_until_ready(score)

    # Sanity check against plain-JAX reference (dropout is identity in eval mode).
    ref = jnp.einsum("btd,dk->btk", x, weight) + bias
    assert score.shape == (B, T, 3)
    assert jnp.allclose(score, ref, atol=1e-5, rtol=1e-5)

    # Exercise the ragged last-block path (M not a multiple of tm, no wrapper pad).
    B2, T2 = 5, 777
    x_big = jax.random.normal(kx, (B2, T2, D), dtype=jnp.float32)
    score_big = classifier_forward(x_big, weight, bias)
    jax.block_until_ready(score_big)
    ref_big = jnp.einsum("btd,dk->btk", x_big, weight) + bias
    assert score_big.shape == (B2, T2, 3)
    assert jnp.allclose(score_big, ref_big, atol=1e-4, rtol=1e-5)

    # bf16 activations path (halved HBM traffic; f32 accumulation in-kernel).
    x_bf16 = x_big.astype(jnp.bfloat16)
    score_bf16 = classifier_forward(x_bf16, weight.astype(jnp.bfloat16), bias)
    jax.block_until_ready(score_bf16)
    ref_bf16 = (jnp.einsum("btd,dk->btk", x_bf16.astype(jnp.float32),
                           weight.astype(jnp.bfloat16).astype(jnp.float32)) + bias)
    assert score_bf16.shape == (B2, T2, 3)
    assert jnp.allclose(score_bf16.astype(jnp.float32), ref_bf16, atol=5e-2, rtol=5e-2)

    print("KERNEL_OK")
</pallas_src>

<mosaic_0001>
module attributes {stable_mosaic.version = 11 : i64} {
  func.func @_classifier_kernel(%arg0: i32, %arg1: memref<16x32xf32, #tpu.memory_space<vmem>>, %arg2: memref<32x3xf32, #tpu.memory_space<vmem>>, %arg3: memref<1x3xf32, #tpu.memory_space<vmem>>, %arg4: memref<16x3xf32, #tpu.memory_space<vmem>>) attributes {dimension_semantics = [#tpu.dimension_semantics<parallel>], iteration_bounds = array<i64: 1>, scalar_prefetch = 0 : i64, scratch_operands = 0 : i64, tpu.core_type = #tpu.core_type<tc>, window_params = [{transform_indices = @transform_0, window_bounds = array<i64: 16, 32>}, {pipeline_mode = #tpu.pipeline_mode<synchronous>, transform_indices = @transform_1, window_bounds = array<i64: 32, 3>}, {pipeline_mode = #tpu.pipeline_mode<synchronous>, transform_indices = @transform_2, window_bounds = array<i64: 1, 3>}, {transform_indices = @transform_3, window_bounds = array<i64: 16, 3>}]} {
    %c0 = arith.constant 0 : index
    %c0_0 = arith.constant 0 : index
    %0 = vector.load %arg1[%c0, %c0_0] : memref<16x32xf32, #tpu.memory_space<vmem>>, vector<16x32xf32>
    %c0_1 = arith.constant 0 : index
    %c0_2 = arith.constant 0 : index
    %1 = vector.load %arg2[%c0_1, %c0_2] : memref<32x3xf32, #tpu.memory_space<vmem>>, vector<32x3xf32>
    %cst = arith.constant dense<0.000000e+00> : vector<16x3xf32>
    %2 = tpu.matmul %0, %1, %cst {dimension_numbers = #tpu.dot_dimension_numbers<[1], [0], [0], [1], [0, 0, 1, 1], [], []>} : vector<16x32xf32>, vector<32x3xf32>, vector<16x3xf32> -> vector<16x3xf32>
    %c0_3 = arith.constant 0 : index
    %c0_4 = arith.constant 0 : index
    %3 = vector.load %arg3[%c0_3, %c0_4] : memref<1x3xf32, #tpu.memory_space<vmem>>, vector<1x3xf32>
    %4 = vector.broadcast %3 : vector<1x3xf32> to vector<16x3xf32>
    %5 = arith.addf %2, %4 : vector<16x3xf32>
    %c0_5 = arith.constant 0 : index
    %c0_6 = arith.constant 0 : index
    %6 = vector.load %arg4[%c0_5, %c0_6] : memref<16x3xf32, #tpu.memory_space<vmem>>, vector<16x3xf32>
    tpu.vector_store %arg4[%c0_5, %c0_6], %5 {strides = array<i32>} : memref<16x3xf32, #tpu.memory_space<vmem>>, vector<16x3xf32>,
    return
  }
  func.func @transform_0(%arg0: i32) -> (i32, i32) {
    %c0_i32 = arith.constant 0 : i32
    %c0_i32_0 = arith.constant 0 : i32
    return %arg0, %c0_i32 : i32, i32
  }
  func.func @transform_1(%arg0: i32) -> (i32, i32) {
    %c0_i32 = arith.constant 0 : i32
    %c0_i32_0 = arith.constant 0 : i32
    %c0_i32_1 = arith.constant 0 : i32
    return %c0_i32, %c0_i32_0 : i32, i32
  }
  func.func @transform_2(%arg0: i32) -> (i32, i32) {
    %c0_i32 = arith.constant 0 : i32
    %c0_i32_0 = arith.constant 0 : i32
    %c0_i32_1 = arith.constant 0 : i32
    return %c0_i32, %c0_i32_0 : i32, i32
  }
  func.func @transform_3(%arg0: i32) -> (i32, i32) {
    %c0_i32 = arith.constant 0 : i32
    %c0_i32_0 = arith.constant 0 : i32
    return %arg0, %c0_i32 : i32, i32
  }
}

</mosaic_0001>

<bundles_post_ra>
// kernel: tpu_custom_call.1
= control target key start
LH: loop header
LB: loop body
LE: loop exit
PB: predicated region body
PF: predicated region fallthrough
CT: control target
= control target key end

     0   :  { %vm27_vm0 = vcmask 261120   ;;  %vm109_vm1 = vcmask 23552   ;;  %s185_s1 = inlined_call_operand.vmem [shape: f32[32,3], index: 1, kind: input, shape index: {}]   ;;  %s186_s0 = inlined_call_operand.vmem [shape: f32[16,32], index: 0, kind: input, shape index: {}]   ;;  %s187_s2 = inlined_call_operand.vmem [shape: f32[1,3], index: 2, kind: input, shape index: {}]   ;;  %s188_s3 = inlined_call_operand.vmem [shape: f32[16,3], index: 3, kind: output, shape index: {}]  }
   0x1   :  { %v19_v0 = vld [vmem:[%s185_s1 + $0x18] sm:$0xff]  ;;  %v18_v1 = vld [vmem:[%s185_s1 + $0x10] sm:$0xff]  ;;  %v14_v2 = vld [vmem:[%s186_s0] sm:$0xff] }
   0x2   :  { %125 = vmatprep.subr.mxu0 %v19_v0  ;;  %v17_v3 = vld [vmem:[%s185_s1 + $0x8] sm:$0xff]  ;;  %133 = vmatprep.mubr.msk.f32.mxu0 %vm27_vm0, %v14_v2  ;;  %v16_v4 = vld [vmem:[%s185_s1] sm:$0xff] }
   0x3   :  { %126 = vmatpush3.msra.mxu0 %v19_v0  ;;  %v15_v5 = vld [vmem:[%s186_s0 + $0x8] sm:$0xff]  ;;  %v116_v6 = vld [vmem:[%s187_s2] ss:$0 sm:$0xff] }
   0x4   :  { %127 = vmatprep.subr.mxu0 %v18_v1 }
   0x5   :  { %128 = vmatpush3.msra.mxu0 %v18_v1 }
   0x6   :  { %129 = vmatprep.subr.mxu0 %v17_v3 }
   0x7   :  { %130 = vmatpush3.msra.mxu0 %v17_v3 }
   0x8   :  { %131 = vmatprep.subr.mxu0 %v16_v4 }
   0x9   :  { %132 = vmatpush3.msra.mxu0 %v16_v4 }
   0xa   :  { %134 = vmatmul.mubr.msk.f32.vlgmr.msra.gmra.mxu0 %vm27_vm0, %v15_v5 }
  0xca   :  { %v135_v7 = vpop.f32.mrf.mxu0 }
  0xcb   :  { %v106_v8 = vadd.f32 %v135_v7, %v116_v6 }
  0xcc   :  { %v100_v9 = vpop.f32.mrf.mxu0 }
  0xcd   :  { %111 = vst.msk [vmem:[%s188_s3 + $0x8] sm:$0xff] %vm109_vm1, %v106_v8  ;;  %v101_v10 = vadd.f32 %v116_v6, %v100_v9 }
  0xcf   :  { %110 = vst.msk [vmem:[%s188_s3] sm:$0xff] %vm109_vm1, %v101_v10 }

</bundles_post_ra>
